<compile_context>
chip_gen: v5e
topology: v5e:2x2
jax: 0.10.0
libtpu: 0.0.40
codegen_flags: <defaults>
</compile_context>

<pallas_src>
import functools

import jax
import jax.numpy as jnp
from jax.experimental import pallas as pl
from jax.experimental.pallas import tpu as pltpu


def _round_up(a, b):
    return ((a + b - 1) // b) * b


def _focal_kernel(gamma, ignore_lb, S, ts, x_ref, lab_ref, psum_ref, pcnt_ref):
    j = pl.program_id(1)

    x = x_ref[0].astype(jnp.float32)                 # (C, ts)
    lab = lab_ref[0]                                 # (1, ts) int32

    # Channel-softmax statistics (channel = sublane axis).
    m = jnp.max(x, axis=0, keepdims=True)            # (1, ts)
    sh = x - m                                       # (C, ts)
    e = jnp.exp(sh)                                  # (C, ts)  only C-wide EUP work
    sum_e = jnp.sum(e, axis=0, keepdims=True)        # (1, ts)

    # Gather the label channel FIRST (one-hot select over sublanes); the focal /
    # log chain then runs on a single (1, ts) row, not the full (C, ts) tile.
    ch = jax.lax.broadcasted_iota(jnp.int32, sh.shape, 0)
    sh_lab = jnp.sum(jnp.where(ch == lab, sh, 0.0), axis=0, keepdims=True)  # (1, ts)

    log_sum = jnp.log(sum_e)                         # (1, ts) EUP
    log_p = sh_lab - log_sum                         # log_softmax at the label
    p = jnp.exp(log_p)                               # softmax at the label (EUP)

    if float(gamma) == int(gamma):
        # Integer power -> plain VALU multiplies (never exp(gamma*log(x))).
        focal = jax.lax.integer_pow(1.0 - p, int(gamma)) * log_p
    else:
        # p may exceed 1.0 by an ulp; clamp so pow(neg, float) can't produce NaN.
        focal = jnp.power(jnp.maximum(1.0 - p, 0.0), float(gamma)) * log_p

    valid = lab != ignore_lb                         # (1, ts)
    if S % ts != 0:
        # Ragged spatial tail: mask lanes past S instead of padding logits in HBM.
        pos = j * ts + jax.lax.broadcasted_iota(jnp.int32, (1, ts), 1)
        valid = jnp.logical_and(valid, pos < S)

    psum_ref[...] = jnp.sum(jnp.where(valid, focal, 0.0)).reshape(1, 1, 1, 1)
    pcnt_ref[...] = jnp.sum(valid.astype(jnp.float32)).reshape(1, 1, 1, 1)


def _pick_tile_and_vmem(S, C, in_itemsize):
    """Pick a spatial tile (multiple of 128) that keeps the per-step VMEM
    footprint inside the chip's budget, preferring divisors of round_up(S, 128)."""
    try:
        vmem_cap = pltpu.get_tpu_info().vmem_capacity_bytes
    except Exception:
        vmem_cap = 64 << 20                          # conservative (v7x-sized)
    budget = min(int(vmem_cap * 0.55), 72 << 20)     # bytes for blocks + temps
    vmem_limit = min(int(vmem_cap * 0.75), 96 << 20)

    # Per-lane bytes: double-buffered logits block + ~4 f32 (C, ts) intermediates
    # + label block / per-pixel rows.
    per_lane = 2 * C * in_itemsize + 4 * C * 4 + 64
    ts_cap = max(128, (budget // per_lane) // 128 * 128)
    ts_cap = min(ts_cap, 32768)

    s128 = _round_up(S, 128)
    if s128 <= ts_cap:
        return s128, vmem_limit                      # one spatial tile per row
    for cand in range(ts_cap, max(128, ts_cap // 2) - 1, -128):
        if s128 % cand == 0:
            return cand, vmem_limit                  # divides -> no wasted tail
    return ts_cap, vmem_limit                        # ragged tail handled in-kernel


def softmax_focal_loss(logits, labels, *, gamma=2, ignore_lb=255):
    N, C, H, W = logits.shape
    assert labels.shape == (N, H, W)
    S = H * W

    x = logits.reshape(N, C, S)                      # free reshape, no pad / copy
    lab = labels.astype(jnp.int32).reshape(N, 1, S)

    ts, vmem_limit = _pick_tile_and_vmem(S, C, jnp.dtype(logits.dtype).itemsize)
    T = (S + ts - 1) // ts

    kernel = functools.partial(_focal_kernel, gamma, ignore_lb, S, ts)

    psum, pcnt = pl.pallas_call(
        kernel,
        out_shape=(
            jax.ShapeDtypeStruct((N, T, 1, 1), jnp.float32),
            jax.ShapeDtypeStruct((N, T, 1, 1), jnp.float32),
        ),
        grid_spec=pltpu.PrefetchScalarGridSpec(
            num_scalar_prefetch=0,
            grid=(N, T),
            in_specs=[
                pl.BlockSpec((1, C, ts), lambda n, j: (n, 0, j)),
                pl.BlockSpec((1, 1, ts), lambda n, j: (n, 0, j)),
            ],
            out_specs=[
                pl.BlockSpec((1, 1, 1, 1), lambda n, j: (n, j, 0, 0)),
                pl.BlockSpec((1, 1, 1, 1), lambda n, j: (n, j, 0, 0)),
            ],
        ),
        compiler_params=pltpu.CompilerParams(
            dimension_semantics=("parallel", "parallel"),
            vmem_limit_bytes=vmem_limit),
    )(x, lab)

    # Tiny final combine of per-(batch, tile) partials (keeps both axes parallel).
    total = jnp.sum(psum)
    count = jnp.sum(pcnt)
    return -total / count


def _softmax_focal_loss_ref(logits, labels, gamma=2, ignore_lb=255):
    # Pure-JAX reference mirroring the PyTorch module (NLLLoss with ignore_index,
    # mean over non-ignored pixels).
    x = logits.astype(jnp.float32)
    scores = jax.nn.softmax(x, axis=1)
    factor = (1.0 - scores) ** gamma
    log_score = factor * jax.nn.log_softmax(x, axis=1)      # (N, C, H, W)
    valid = labels != ignore_lb
    safe = jnp.where(valid, labels, 0).astype(jnp.int32)
    gathered = jnp.take_along_axis(log_score, safe[:, None, :, :], axis=1)[:, 0]
    return -jnp.sum(jnp.where(valid, gathered, 0.0)) / jnp.sum(valid)


if __name__ == "__main__":
    key = jax.random.PRNGKey(0)
    k1, k2, k3 = jax.random.split(key, 3)
    N, C, H, W = 2, 4, 16, 16
    logits = jax.random.normal(k1, (N, C, H, W), dtype=jnp.float32)
    labels = jax.random.randint(k2, (N, H, W), 0, C, dtype=jnp.int32)
    ignore = jax.random.bernoulli(k3, 0.1, (N, H, W))
    labels = jnp.where(ignore, jnp.int32(255), labels)

    loss = jax.block_until_ready(softmax_focal_loss(logits, labels))
    ref = jax.block_until_ready(_softmax_focal_loss_ref(logits, labels))
    assert jnp.allclose(loss, ref, rtol=1e-5, atol=1e-5), (loss, ref)
    print("KERNEL_OK")
</pallas_src>

<mosaic_0001>
module attributes {stable_mosaic.version = 11 : i64} {
  func.func @_focal_kernel(%arg0: i32, %arg1: i32, %arg2: memref<1x4x256xf32, #tpu.memory_space<vmem>>, %arg3: memref<1x1x256xi32, #tpu.memory_space<vmem>>, %arg4: memref<1x1x1x1xf32, #tpu.memory_space<vmem>>, %arg5: memref<1x1x1x1xf32, #tpu.memory_space<vmem>>) attributes {dimension_semantics = [#tpu.dimension_semantics<parallel>, #tpu.dimension_semantics<parallel>], iteration_bounds = array<i64: 2, 1>, scalar_prefetch = 0 : i64, scratch_operands = 0 : i64, tpu.core_type = #tpu.core_type<tc>, window_params = [{transform_indices = @transform_0, window_bounds = array<i64: 1, 4, 256>}, {transform_indices = @transform_1, window_bounds = array<i64: 1, 1, 256>}, {transform_indices = @transform_2, window_bounds = array<i64: 1, 1, 1, 1>}, {transform_indices = @transform_3, window_bounds = array<i64: 1, 1, 1, 1>}]} {
    %c0 = arith.constant 0 : index
    %c0_0 = arith.constant 0 : index
    %c0_1 = arith.constant 0 : index
    %0 = vector.load %arg2[%c0, %c0_0, %c0_1] : memref<1x4x256xf32, #tpu.memory_space<vmem>>, vector<1x4x256xf32>
    %1 = vector.shape_cast %0 : vector<1x4x256xf32> to vector<4x256xf32>
    %c0_2 = arith.constant 0 : index
    %c0_3 = arith.constant 0 : index
    %c0_4 = arith.constant 0 : index
    %2 = vector.load %arg3[%c0_2, %c0_3, %c0_4] : memref<1x1x256xi32, #tpu.memory_space<vmem>>, vector<1x1x256xi32>
    %3 = vector.shape_cast %2 : vector<1x1x256xi32> to vector<1x256xi32>
    %cst = arith.constant dense<0xFF800000> : vector<256xf32>
    %4 = vector.multi_reduction <maximumf>, %1, %cst [0] : vector<4x256xf32> to vector<256xf32>
    %5 = vector.shape_cast %4 : vector<256xf32> to vector<1x256xf32>
    %6 = vector.broadcast %5 : vector<1x256xf32> to vector<4x256xf32>
    %7 = arith.subf %1, %6 : vector<4x256xf32>
    %8 = math.exp %7 : vector<4x256xf32>
    %cst_5 = arith.constant dense<0.000000e+00> : vector<256xf32>
    %9 = vector.multi_reduction <add>, %8, %cst_5 [0] : vector<4x256xf32> to vector<256xf32>
    %10 = vector.shape_cast %9 : vector<256xf32> to vector<1x256xf32>
    %11 = tpu.iota {dimensions = array<i32: 0>} : vector<4x256xi32>
    %12 = vector.broadcast %3 : vector<1x256xi32> to vector<4x256xi32>
    %13 = arith.cmpi eq, %11, %12 : vector<4x256xi32>
    %cst_6 = arith.constant 0.000000e+00 : f32
    %14 = vector.broadcast %cst_6 : f32 to vector<4x256xf32>
    %15 = arith.select %13, %7, %14 : vector<4x256xi1>, vector<4x256xf32>
    %cst_7 = arith.constant dense<0.000000e+00> : vector<256xf32>
    %16 = vector.multi_reduction <add>, %15, %cst_7 [0] : vector<4x256xf32> to vector<256xf32>
    %17 = vector.shape_cast %16 : vector<256xf32> to vector<1x256xf32>
    %18 = math.log %10 : vector<1x256xf32>
    %19 = arith.subf %17, %18 : vector<1x256xf32>
    %20 = math.exp %19 : vector<1x256xf32>
    %cst_8 = arith.constant 1.000000e+00 : f32
    %21 = vector.broadcast %cst_8 : f32 to vector<1x256xf32>
    %22 = arith.subf %21, %20 : vector<1x256xf32>
    %23 = arith.mulf %22, %22 : vector<1x256xf32>
    %24 = arith.mulf %23, %19 : vector<1x256xf32>
    %c255_i32 = arith.constant 255 : i32
    %25 = vector.broadcast %c255_i32 : i32 to vector<1x256xi32>
    %26 = arith.cmpi ne, %3, %25 : vector<1x256xi32>
    %cst_9 = arith.constant 0.000000e+00 : f32
    %27 = vector.broadcast %cst_9 : f32 to vector<1x256xf32>
    %28 = arith.select %26, %24, %27 : vector<1x256xi1>, vector<1x256xf32>
    %29 = vector.shape_cast %28 : vector<1x256xf32> to vector<1x1x256xf32>
    %cst_10 = arith.constant dense<0.000000e+00> : vector<1xf32>
    %30 = vector.multi_reduction <add>, %29, %cst_10 [1, 2] : vector<1x1x256xf32> to vector<1xf32>
    %31 = vector.shape_cast %30 : vector<1xf32> to vector<1x1x1xf32>
    %32 = vector.extract %31[0, 0, 0] : f32 from vector<1x1x1xf32>
    %33 = vector.broadcast %32 : f32 to vector<1x1x1x1xf32>
    %c0_11 = arith.constant 0 : index
    %c0_12 = arith.constant 0 : index
    %c0_13 = arith.constant 0 : index
    %c0_14 = arith.constant 0 : index
    %34 = vector.load %arg4[%c0_11, %c0_12, %c0_13, %c0_14] : memref<1x1x1x1xf32, #tpu.memory_space<vmem>>, vector<1x1x1x1xf32>
    tpu.vector_store %arg4[%c0_11, %c0_12, %c0_13, %c0_14], %33 {strides = array<i32>} : memref<1x1x1x1xf32, #tpu.memory_space<vmem>>, vector<1x1x1x1xf32>,
    %35 = arith.extui %26 : vector<1x256xi1> to vector<1x256xi32>
    %36 = arith.sitofp %35 : vector<1x256xi32> to vector<1x256xf32>
    %37 = vector.shape_cast %36 : vector<1x256xf32> to vector<1x1x256xf32>
    %cst_15 = arith.constant dense<0.000000e+00> : vector<1xf32>
    %38 = vector.multi_reduction <add>, %37, %cst_15 [1, 2] : vector<1x1x256xf32> to vector<1xf32>
    %39 = vector.shape_cast %38 : vector<1xf32> to vector<1x1x1xf32>
    %40 = vector.extract %39[0, 0, 0] : f32 from vector<1x1x1xf32>
    %41 = vector.broadcast %40 : f32 to vector<1x1x1x1xf32>
    %c0_16 = arith.constant 0 : index
    %c0_17 = arith.constant 0 : index
    %c0_18 = arith.constant 0 : index
    %c0_19 = arith.constant 0 : index
    %42 = vector.load %arg5[%c0_16, %c0_17, %c0_18, %c0_19] : memref<1x1x1x1xf32, #tpu.memory_space<vmem>>, vector<1x1x1x1xf32>
    tpu.vector_store %arg5[%c0_16, %c0_17, %c0_18, %c0_19], %41 {strides = array<i32>} : memref<1x1x1x1xf32, #tpu.memory_space<vmem>>, vector<1x1x1x1xf32>,
    return
  }
  func.func @transform_0(%arg0: i32, %arg1: i32) -> (i32, i32, i32) {
    %c0_i32 = arith.constant 0 : i32
    %c0_i32_0 = arith.constant 0 : i32
    return %arg0, %c0_i32, %arg1 : i32, i32, i32
  }
  func.func @transform_1(%arg0: i32, %arg1: i32) -> (i32, i32, i32) {
    %c0_i32 = arith.constant 0 : i32
    %c0_i32_0 = arith.constant 0 : i32
    return %arg0, %c0_i32, %arg1 : i32, i32, i32
  }
  func.func @transform_2(%arg0: i32, %arg1: i32) -> (i32, i32, i32, i32) {
    %c0_i32 = arith.constant 0 : i32
    %c0_i32_0 = arith.constant 0 : i32
    %c0_i32_1 = arith.constant 0 : i32
    return %arg0, %arg1, %c0_i32, %c0_i32_0 : i32, i32, i32, i32
  }
  func.func @transform_3(%arg0: i32, %arg1: i32) -> (i32, i32, i32, i32) {
    %c0_i32 = arith.constant 0 : i32
    %c0_i32_0 = arith.constant 0 : i32
    %c0_i32_1 = arith.constant 0 : i32
    return %arg0, %arg1, %c0_i32, %c0_i32_0 : i32, i32, i32, i32
  }
}

</mosaic_0001>

<bundles_post_ra>
// kernel: tpu_custom_call.1
= control target key start
LH: loop header
LB: loop body
LE: loop exit
PB: predicated region body
PF: predicated region fallthrough
CT: control target
= control target key end

     0   :  { %9 = vsyncpa [#allocation3], 0  ;;  %s909_s0 = inlined_call_operand.hbm [shape: f32[2,4,256], index: 0, kind: input, shape index: {}]   ;;  %s910_s1 = inlined_call_operand.hbm [shape: s32[2,1,256], index: 1, kind: input, shape index: {}]   ;;  %s911_s2 = inlined_call_operand.vmem [shape: f32[2,1,1,1], index: 2, kind: output, shape index: {0}]   ;;  %s912_s3 = inlined_call_operand.vmem [shape: f32[2,1,1,1], index: 3, kind: output, shape index: {1}]  }
   0x1   :  { %11 = vsyncpa [#allocation3 + $0x1], 0 }
   0x2   :  { %12 = vsyncpa [#allocation5], 0 }
   0x3   :  { %14 = vsyncpa [#allocation5 + $0x1], 0  ;;  %s785_s12 = smov 0   ;;  %s787_s13 = smov 0  }
   0x4   :  { %s789_s14 = smov 0   ;;  %s791_s15 = smov 0  }
   0x5   :  { %s793_s16 = smov 0   ;;  %s795_s17 = smov 0  }
   0x6 LB: > { %s557_s18 = sadd.s32 4294967295, %s762_s17   ;;  %s32_s19 = sadd.s32 1, %s758_s16  ;;  %s762_s17 = sphi %s795_s17, %s20_s17   ;;  %s758_s16 = sphi %s793_s16, %s920_s16   ;;  %s754_s15 = sphi %s791_s15, %s919_s15   ;;  %s750_s14 = sphi %s789_s14, %s918_s14   ;;  %s746_s13 = sphi %s787_s13, %s917_s13   ;;  %s742_s12 = sphi %s785_s12, %s916_s12  }
   0x7   : > { %p34_p0 = scmp.ge.s32.totalorder %s32_s19, 2  ;;  %s41_s20 = sadd.s32 1, %s750_s14 }
   0x8   : > { %p48_p1 = scmp.ne.s32.totalorder %s750_s14, %s746_s13  ;;  %p49_p2 = scmp.eq.s32.totalorder %s762_s17, 0 }
   0x9   : > { %s922_s19 = smov (%p34_p0, %s32_s19), 0  ;;  %p54_p4 = scmp.ne.s32.totalorder %s746_s13, %s742_s12 }
   0xa   : > { %p821_p3 = por %p49_p2, %p48_p1  ;;  %s36_s22 = ssub.s32 %s758_s16, %s922_s19 }
   0xb   : > { %p55_p5 = scmp.eq.s32.totalorder %s557_s18, 0  ;;  %p39_p6 = scmp.eq.s32.totalorder %s36_s22, 0 }
   0xc   : > { %p588_p8 = scmp.lt.s32.totalorder %s762_s17, 2  ;;  %s162_s25 = sand.u32 1, %s750_s14  }
   0xd   : > { %p828_p7 = por %p55_p5, %p54_p4  ;;  %s572_s26 = sshll.u32 %s758_s16, 3 }
   0xe   : > { %s834_s24 = scalar_select %p39_p6, %s750_s14, %s41_s20  }
   0xf   : > { %s561_s27 = sshll.u32 %s162_s25, 3  ;;  %s173_s30 = scalar_lea.hbm %s909_s0, %s572_s26 }
  0x10   : > { %s175_s4 = sshll.u32 %s173_s30, 4  ;;  %s166_s5 = scalar_lea.vmem [#allocation2], %s561_s27  ;;  %s176_s4 = int_to_ptr.hbm [resolvable:$true] %s175_s4 }
  0x11   : > { %s177_s6 = sshll.u32 %s166_s5, 4  ;;  %p843_p9 = pnand %p588_p8, %p821_p3  ;;  %s178_s6 = int_to_ptr.vmem [resolvable:$true] %s177_s6 }
  0x12   : > { %p566_p10 = scmp.ge.s32.totalorder %s762_s17, 1  ;;  %p203_p11 = scmp.lt.s32.totalorder %s762_s17, 3 }
  0x13   : > { %s564_s8 = sshll.u32 %s162_s25, 1  ;;  %s163_s9 = scalar_lea.sflag [#allocation3], %s162_s25 }
  0x14   : > { %584 = dma.hbm_to_vmem [thread:$0]  (!%p843_p9), %s176_s4, 128, %s178_s6, %s163_s9  }
  0x15   : > { %p204_p12 = pnand %p566_p10, %p203_p11  ;;  %s565_s10 = sshll.u32 %s758_s16, 1 }
  0x16   : > { %s188_s11 = scalar_lea.vmem [#allocation4], %s564_s8  ;;  %s194_s21 = scalar_lea.hbm %s910_s1, %s565_s10 }
  0x17   : > { %s198_s12 = sshll.u32 %s188_s11, 4  ;;  %s196_s22 = sshll.u32 %s194_s21, 4  ;;  %s199_s12 = int_to_ptr.vmem [resolvable:$true] %s198_s12  ;;  %s197_s22 = int_to_ptr.hbm [resolvable:$true] %s196_s22 }
  0x18   : > { %s185_s26 = scalar_lea.sflag [#allocation5], %s162_s25  ;;  %207 = sbr.rel (%p204_p12) target bundleno = 314 (0x13a), region = 28 }
  0x19   : > { %587 = dma.hbm_to_vmem [thread:$0]  (!%p843_p9), %s197_s22, 32, %s199_s12, %s185_s26  }
  0x1a   : > { %s209_s27 = sand.u32 (!%p204_p12), 1, %s746_s13  }
  0x1b   : > { %s567_s28 = sshll.u32 (!%p204_p12), %s209_s27, 3  ;;  %s210_s29 = scalar_lea.sflag (!%p204_p12), [#allocation3], %s209_s27 }
  0x1c   : > { %s213_s30 = scalar_lea.vmem (!%p204_p12), [#allocation2], %s567_s28 }
  0x1d   : > { %733 = dma.done.wait (%p828_p7), %s210_s29, 128  }
  0x1e   : > { %735 = vsyncadd (%p828_p7), %s210_s29, 4294967168  ;;  %s568_s4 = sshll.u32 %s209_s27, 1  ;;  %s220_s5 = scalar_lea.sflag [#allocation5], %s209_s27 }
  0x1f   : > { %s223_s6 = scalar_lea.vmem [#allocation4], %s568_s4 }
  0x20   : > { %737 = dma.done.wait (%p828_p7), %s220_s5, 32  }
  0x21   : > { %739 = vsyncadd (%p828_p7), %s220_s5, 4294967264  ;;  %v273_v0 = vld [vmem:[%s213_s30] sm:$0xff]  ;;  %vm281_vm0 = vcmask 1043456   ;;  %v324_v22 = vlaneseq  ;;  %v869_v23 = vld [vmem:[%s223_s6] sm:$0x3]  ;;  %vm372_vm3 = vcmask 1040384  }
  0x22   : > { %276 = vst [vmem:[#allocation1] ss:$2 sm:$0xff] %v273_v0  ;;  %v326_v31 = vperm.slane %v869_v23, 0  ;;  %v327_v32 = vperm.slane %v869_v23, 1  ;;  %vm368_vm4 = vcmp.ne.s32.totalorder %v869_v23, 255  ;;  %p261_p13 = scmp.lt.s32.totalorder %s754_s15, 1 }
  0x23   : > { %v325_v28 = vshrl.u32 %v324_v22, 7  ;;  %vm394_vm5 = vcmask 0  }
  0x24   : > { %s924_s15 = smov (!%p261_p13, %s754_s15), 1 }
  0x25   : > { %vm328_vm1 = vcmp.eq.s32.totalorder %v325_v28, %v326_v31  ;;  %vm329_vm2 = vcmp.eq.s32.totalorder %v325_v28, %v327_v32  ;;  %s266_s7 = scalar_lea.vmem %s911_s2, %s924_s15  ;;  %s272_s11 = scalar_lea.vmem %s912_s3, %s924_s15 }
  0x29   : > { %v277_v1 = vld.sshfl [vmem:[#allocation1] sm:$0xff pattern:$0x75316420]  ;;  %v278_v2 = vld.sshfl [vmem:[#allocation1 + $0x8] sm:$0xff pattern:$0x75316420] }
  0x2a   : > { %v282_v3 = vsel %vm281_vm0, %v277_v1, -inf  ;;  %v289_v4 = vsel %vm281_vm0, %v278_v2, -inf }
  0x2b   : > { %v283_v5 = vrot.slane %v282_v3, 4  ;;  %v290_v6 = vrot.slane %v289_v4, 4 }
  0x2d   : > { %v284_v7 = vmax.f32 %v282_v3, %v283_v5  ;;  %v291_v8 = vmax.f32 %v289_v4, %v290_v6 }
  0x2f   : > { %v285_v9 = vrot.slane %v284_v7, 2  ;;  %v292_v10 = vrot.slane %v291_v8, 2 }
  0x31   : > { %v286_v11 = vmax.f32 %v284_v7, %v285_v9  ;;  %v293_v12 = vmax.f32 %v291_v8, %v292_v10 }
  0x33   : > { %v287_v13 = vrot.slane %v286_v11, 1  ;;  %v294_v14 = vrot.slane %v293_v12, 1 }
  0x35   : > { %v288_v15 = vmax.f32 %v286_v11, %v287_v13  ;;  %v295_v16 = vmax.f32 %v293_v12, %v294_v14 }
  0x37   : > { %v298_v17 = vrot.slane %v295_v16, 4  ;;  %v764_v16 = vmov 0.0  }
  0x39   : > { %v299_v18 = vsel %vm281_vm0, %v288_v15, %v298_v17  ;;  %v569_v17 = vsel %vm368_vm4, 1.0, %v764_v16 }
  0x3a   : > { %v301_v19 = vsub.f32 %v273_v0, %v299_v18  ;;  %v399_v22 = vperm.slane %v569_v17, 0 }
  0x3c   : > { %v302_v20 = vmul.f32 1.442695, %v301_v19 }
  0x3e   : > { %638 = vpow2.f32 %v302_v20 }
  0x44   : > { %v639_v21 = vpop.eup %638 }
  0x45   : > { %305 = vst [vmem:[#allocation1] ss:$2 sm:$0xff] %v639_v21 }
  0x4c   : > { %v306_v24 = vld.sshfl [vmem:[#allocation1] sm:$0xff pattern:$0x75316420]  ;;  %v307_v25 = vld.sshfl [vmem:[#allocation1 + $0x8] sm:$0xff pattern:$0x75316420] }
  0x4d   : > { %v310_v26 = vsel %vm281_vm0, %v306_v24, 0.0  ;;  %v317_v27 = vsel %vm281_vm0, %v307_v25, 0.0  ;;  %331 = vst [vmem:[#allocation1] ss:$2 sm:$0xff] %v301_v19  ;;  %v400_v24 = vperm.slane %v569_v17, 1 }
  0x4e   : > { %v311_v29 = vrot.slane %v310_v26, 4  ;;  %v318_v30 = vrot.slane %v317_v27, 4 }
  0x4f   : > { %v404_v23 = vsel %vm372_vm3, %v400_v24, 0.0 }
  0x50   : > { %v312_v33 = vadd.f32 %v311_v29, %v310_v26  ;;  %v319_v34 = vadd.f32 %v318_v30, %v317_v27  ;;  %v403_v26 = vsel %vm372_vm3, %v399_v22, 0.0 }
  0x51   : > { %v405_v27 = vadd.f32 %v404_v23, %v403_v26 }
  0x52   : > { %v313_v35 = vrot.slane %v312_v33, 2  ;;  %v320_v36 = vrot.slane %v319_v34, 2 }
  0x54   : > { %v314_v37 = vadd.f32 %v313_v35, %v312_v33  ;;  %v321_v38 = vadd.f32 %v320_v36, %v319_v34  ;;  %v332_v39 = vld.sshfl [vmem:[#allocation1] sm:$0xff pattern:$0x75316420]  ;;  %v333_v40 = vld.sshfl [vmem:[#allocation1 + $0x8] sm:$0xff pattern:$0x75316420] }
  0x55   : > { %v336_v41 = vsel %vm328_vm1, %v332_v39, 0.0  ;;  %v337_v42 = vsel %vm329_vm2, %v333_v40, 0.0 }
  0x56   : > { %v315_v43 = vrot.slane %v314_v37, 1  ;;  %v322_v44 = vrot.slane %v321_v38, 1  ;;  %v338_v45 = vsel %vm281_vm0, %v336_v41, 0.0  ;;  %v345_v46 = vsel %vm281_vm0, %v337_v42, 0.0 }
  0x57   : > { %v339_v47 = vrot.slane %v338_v45, 4  ;;  %v346_v48 = vrot.slane %v345_v46, 4 }
  0x58   : > { %v316_v49 = vadd.f32 %v315_v43, %v314_v37  ;;  %v323_v50 = vadd.f32 %v322_v44, %v321_v38 }
  0x59   : > { %v340_v51 = vadd.f32 %v339_v47, %v338_v45  ;;  %v347_v52 = vadd.f32 %v346_v48, %v345_v46 }
  0x5a   : > { %640 = vlog2.f32 %v316_v49 }
  0x5b   : > { %v341_v53 = vrot.slane %v340_v51, 2  ;;  %v348_v54 = vrot.slane %v347_v52, 2  ;;  %642 = vlog2.f32 %v323_v50 }
  0x5d   : > { %v342_v55 = vadd.f32 %v341_v53, %v340_v51  ;;  %v349_v56 = vadd.f32 %v348_v54, %v347_v52 }
  0x5f   : > { %v343_v57 = vrot.slane %v342_v55, 1  ;;  %v350_v58 = vrot.slane %v349_v56, 1 }
  0x60   : > { %v641_v59 = vpop.eup %640 }
  0x61   : > { %v643_v60 = vpop.eup %642  ;;  %v344_v61 = vadd.f32 %v343_v57, %v342_v55  ;;  %v351_v62 = vadd.f32 %v350_v58, %v349_v56  ;;  %v353_v63 = vmul.f32 0.6931472, %v641_v59 }
  0x62   : > { %v355_v0 = vmul.f32 0.6931472, %v643_v60 }
  0x63   : > { %v356_v1 = vsub.f32 %v344_v61, %v353_v63 }
  0x64   : > { %v357_v2 = vsub.f32 %v351_v62, %v355_v0 }
  0x65   : > { %v358_v3 = vmul.f32 1.442695, %v356_v1 }
  0x66   : > { %v360_v4 = vmul.f32 1.442695, %v357_v2 }
  0x67   : > { %644 = vpow2.f32 %v358_v3 }
  0x68   : > { %646 = vpow2.f32 %v360_v4 }
  0x6d   : > { %v645_v5 = vpop.eup %644 }
  0x6e   : > { %v647_v6 = vpop.eup %646  ;;  %v362_v7 = vsub.f32 1.0, %v645_v5 }
  0x6f   : > { %v363_v8 = vsub.f32 1.0, %v647_v6 }
  0x70   : > { %v364_v9 = vmul.f32 %v362_v7, %v362_v7 }
  0x71   : > { %v365_v10 = vmul.f32 %v363_v8, %v363_v8 }
  0x72   : > { %v366_v11 = vmul.f32 %v364_v9, %v356_v1 }
  0x73   : > { %v367_v12 = vmul.f32 %v365_v10, %v357_v2 }
  0x75   : > { %v371_v13 = vrot.slane %v367_v12, 7 }
  0x77   : > { %v373_v14 = vsel %vm372_vm3, %v366_v11, %v371_v13 }
  0x78   : > { %v375_v15 = vsel %vm368_vm4, %v373_v14, 0.0 }
  0x79   : > { %v377_v18 = vperm.slane %v375_v15, 0  ;;  %v378_v19 = vperm.slane %v375_v15, 1 }
  0x7b   : > { %v381_v20 = vsel %vm372_vm3, %v377_v18, 0.0  ;;  %v382_v21 = vsel %vm372_vm3, %v378_v19, 0.0 }
  0x7c   : > { %v383_v25 = vadd.f32 %v382_v21, %v381_v20 }
  0x7e   : > { %384 = vadd.xlane.f32.xlu0 %v383_v25 }
  0x86   : > { %406 = vadd.xlane.f32.xlu0 %v405_v27 }
  0xf1   : > { %v385_v28 = vpop.xlane.xlu0 %384 }
  0xf2   : > { %v386_v29 = vrot.slane %v385_v28, 4 }
  0xf4   : > { %v387_v30 = vadd.f32 %v386_v29, %v385_v28 }
  0xf6   : > { %v388_v31 = vrot.slane %v387_v30, 2 }
  0xf8   : > { %v389_v32 = vadd.f32 %v388_v31, %v387_v30 }
  0xf9   : > { %v407_v33 = vpop.xlane.xlu0 %406 }
  0xfa   : > { %v408_v34 = vrot.slane %v407_v33, 4  ;;  %v390_v35 = vrot.slane %v389_v32, 1 }
  0xfc   : > { %v409_v36 = vadd.f32 %v408_v34, %v407_v33  ;;  %v391_v37 = vadd.f32 %v390_v35, %v389_v32 }
  0xfe   : > { %v410_v38 = vrot.slane %v409_v36, 2  ;;  %573 = vpush %v391_v37 }
 0x100   : > { %v411_v39 = vadd.f32 %v410_v38, %v409_v36 }
 0x102   : > { %v412_v40 = vrot.slane %v411_v39, 1 }
 0x104   : > { %v413_v41 = vadd.f32 %v412_v40, %v411_v39 }
 0x106   : > { %575 = vpush %v413_v41 }
 0x12f   : > { %s574_s8 = spop %573 }
 0x130   : > { %v393_v42 = vstv %s574_s8 }
 0x131   : > { %395 = vst.msk [vmem:[%s266_s7] sm:$0x1] %vm394_vm5, %v393_v42 }
 0x137   : > { %s576_s12 = spop %575 }
 0x138   : > { %v415_v43 = vstv %s576_s12 }
 0x139   : > { %416 = vst.msk [vmem:[%s272_s11] sm:$0x1] %vm394_vm5, %v415_v43 }
 0x13a PF: > { %s20_s17 = sadd.s32 1, %s762_s17   ;;  %s916_s12 = smov %s746_s13 }
 0x13b   : > { %p17_p0 = scmp.ge.s32.totalorder %s20_s17, 4   ;;  %s917_s13 = smov %s750_s14 }
 0x13c   : > { %s918_s14 = smov %s834_s24  ;;  %s919_s15 = smov %s758_s16 }
 0x13d   : > { %s920_s16 = smov %s922_s19  ;;  %19 = sbr.rel (!%p17_p0) target bundleno = 6 (0x6), region = 93 }
 0x142   :  { %458 = vsyncpa [#allocation3], 1 }
 0x143   :  { %460 = vsyncpa [#allocation3 + $0x1], 1 }
 0x144   :  { %461 = vsyncpa [#allocation5], 1 }
 0x145   :  { %463 = vsyncpa [#allocation5 + $0x1], 1 }

</bundles_post_ra>
